<compile_context>
chip_gen: v6e
topology: v6e:2x2x1
jax: 0.10.0
libtpu: 0.0.40
codegen_flags: <defaults>
</compile_context>

<pallas_src>
import jax
import jax.numpy as jnp
import numpy as np
from jax.experimental import pallas as pl
from jax.experimental.pallas import tpu as pltpu

LEAKY_SLOPE = 0.01          # F.leaky_relu default negative slope
MASK_VALUE = -1e30          # finite "minus infinity" for non-edges (no NaN paths)
M_INIT = 0.5 * MASK_VALUE   # running-max init; guarantees exp(MASK - m) == 0 exactly


def _round_up(x, m):
    return ((x + m - 1) // m) * m


def _pick_tile(n_pad, max_tile):
    """Largest multiple of 128 that divides n_pad and is <= max_tile."""
    best = 128
    t = 128
    while t <= min(max_tile, n_pad):
        if n_pad % t == 0:
            best = t
        t += 128
    return best


def _vmem_capacity_bytes():
    try:
        cap = getattr(pltpu.get_tpu_info(), "vmem_capacity_bytes", None)
        if cap:
            return int(cap)
    except Exception:
        pass
    return 64 << 20   # conservative fallback (v7x per-TensorCore)


# --------------------------- stage 1: projection ---------------------------
def _make_project_kernel(ones_col):
    def kernel(h_ref, w_ref, a_src_ref, a_dst_ref, z_ref, s_src_ref, s_dst_ref):
        # z = h @ Wfc^T for this tile of nodes (f32 accumulation on the MXU).
        z = jnp.dot(h_ref[...], w_ref[...], preferred_element_type=jnp.float32)
        # Attention scores as VPU lane-reductions (stay f32 for the softmax).
        # a_src / a_dst are zero in the padded lanes, so the ones-lane below
        # cannot leak into the scores.
        s_src_ref[...] = jnp.sum(z * a_src_ref[...], axis=-1, keepdims=True)
        s_dst_ref[...] = jnp.sum(z * a_dst_ref[...], axis=-1, keepdims=True)
        # Write 1.0 into one unused padded lane: stage 2's p @ z then accumulates
        # the softmax denominator in that column on the MXU (no XLU row-sum).
        lane = jax.lax.broadcasted_iota(jnp.int32, z.shape, 1)
        z = jnp.where(lane == ones_col, 1.0, z)
        z_ref[...] = z.astype(z_ref.dtype)
    return kernel


# ------------------- stage 2: masked softmax + aggregation ------------------
def _make_attention_kernel(ones_col, t_src, z_resident):
    def kernel(s_dst_ref, s_src_ref, adj_ref, z_ref, out_ref, m_ref):
        j = pl.program_id(1)

        @pl.when(j == 0)
        def _():
            m_ref[...] = jnp.full_like(m_ref, M_INIT)
            out_ref[...] = jnp.zeros_like(out_ref)   # out block is the accumulator

        if z_resident:
            # z is the whole (n_pad, d_pad) array, resident in VMEM; slice the
            # current src rows (start is a multiple of t_src -> aligned).
            src0 = pl.multiple_of(j * t_src, t_src)
            z_blk = z_ref[pl.ds(src0, t_src), :]
        else:
            z_blk = z_ref[...]

        # e[d, s] = leaky_relu(z_s·a_src + z_d·a_dst) where an edge exists, else MASK.
        e = s_dst_ref[...] + s_src_ref[...]          # [TD, TS] f32 via broadcast
        e = jnp.maximum(e, LEAKY_SLOPE * e)          # leaky_relu (valid: slope < 1)
        e = jnp.where(adj_ref[...] != 0, e, MASK_VALUE)

        # Online (flash-style) masked softmax over the src axis.
        # m is initialised to 0.5*MASK_VALUE, so m_new >= 0.5*MASK_VALUE always and
        # exp(MASK_VALUE - m_new) underflows to exactly 0: no post-exp mask needed.
        # Rows with zero in-edges keep acc == 0; the final guard maps them to 0.
        m_prev = m_ref[...]
        m_new = jnp.maximum(m_prev, jnp.max(e, axis=-1, keepdims=True))
        p = jnp.exp(e - m_new)
        corr = jnp.exp(m_prev - m_new)               # == 0 once real edges appear
        # One MXU matmul produces both the weighted sum and (in column `ones_col`,
        # z's ones-lane) the softmax denominator.
        out_ref[...] = corr * out_ref[...] + jnp.dot(
            p.astype(z_blk.dtype), z_blk, preferred_element_type=jnp.float32)
        m_ref[...] = m_new

        @pl.when(j == pl.num_programs(1) - 1)
        def _():
            acc = out_ref[...]
            # Guard l == 0 (no in-edges / padded dst rows) -> output 0.
            l = jnp.maximum(acc[:, ones_col:ones_col + 1], 1e-20)
            r = pl.reciprocal(l, approx=True)        # EUP slot (otherwise idle)
            r = r * (2.0 - l * r)                    # two Newton steps -> ~f32 exact
            r = r * (2.0 - l * r)
            out_ref[...] = acc * r
    return kernel


# --------------------------------- wrapper ----------------------------------
def gat_layer(h, w_fc, w_attn, adj, *, compute_dtype=jnp.bfloat16,
              dst_tile=512, src_tile=2048, proj_tile=256, z_resident=None):
    """Single-head GAT forward.

    h:      [N, in_dim]        node features
    w_fc:   [out_dim, in_dim]  fc.weight (no bias)
    w_attn: [1, 2*out_dim]     attn_fc.weight ([:out_dim] -> src z, [out_dim:] -> dst z)
    adj:    [N, N]             adj[dst, src] != 0 iff edge src -> dst.  Pass it already
                               padded to [n_pad, n_pad] int8 to skip the only remaining
                               O(N^2) wrapper pass.
    """
    N, in_dim = h.shape
    out_dim = w_fc.shape[0]
    f32 = jnp.float32

    # +1 reserves a padded lane that carries the softmax denominator through the MXU.
    d_pad = _round_up(out_dim + 1, 128)
    ones_col = out_dim
    n_pad = _round_up(N, 128)

    # Tiles: keep >= 2 dst tiles when possible (v7x drives its 2 TensorCores off the
    # "parallel" axis); make the src tile as large as divides n_pad (fewer grid steps,
    # fewer corr*acc rescale passes, bigger adj DMAs).
    t_dst = _pick_tile(n_pad, min(dst_tile, max(128, n_pad // 2)))
    t_src = _pick_tile(n_pad, src_tile)
    t_proj = _pick_tile(n_pad, min(proj_tile, max(128, n_pad // 2)))

    # Pad + cast operands. Zero padding is inert: padded src columns have no edges,
    # padded feature lanes have zero weights, padded dst rows are sliced off below.
    h_p = jnp.pad(h.astype(f32), ((0, n_pad - N), (0, 0))).astype(compute_dtype)
    w_t = jnp.pad(jnp.transpose(w_fc).astype(f32),
                  ((0, 0), (0, d_pad - out_dim))).astype(compute_dtype)   # [in, d_pad]
    a_src = jnp.pad(w_attn[0, :out_dim].astype(f32),
                    (0, d_pad - out_dim)).reshape(1, d_pad)
    a_dst = jnp.pad(w_attn[0, out_dim:].astype(f32),
                    (0, d_pad - out_dim)).reshape(1, d_pad)

    # Adjacency as an int8 0/1 mask: quarters the dominant O(N^2) HBM stream vs f32
    # and avoids bf16 compares on v5e.  If the caller already supplies the padded
    # int8 mask, no wrapper pass over N^2 happens at all.
    if adj.dtype == jnp.int8 and adj.shape == (n_pad, n_pad):
        adj_p = adj
    else:
        adj_p = jnp.pad((adj != 0).astype(jnp.int8),
                        ((0, n_pad - N), (0, n_pad - N)))

    # ---- stage 1: node projection + per-node attention scores (z computed once) ----
    z_p, s_src_col, s_dst_col = pl.pallas_call(
        _make_project_kernel(ones_col),
        out_shape=(jax.ShapeDtypeStruct((n_pad, d_pad), compute_dtype),
                   jax.ShapeDtypeStruct((n_pad, 1), f32),
                   jax.ShapeDtypeStruct((n_pad, 1), f32)),
        grid_spec=pltpu.PrefetchScalarGridSpec(
            num_scalar_prefetch=0,
            grid=(n_pad // t_proj,),
            in_specs=[
                pl.BlockSpec((t_proj, in_dim), lambda i: (i, 0)),
                pl.BlockSpec((in_dim, d_pad), lambda i: (0, 0)),
                pl.BlockSpec((1, d_pad), lambda i: (0, 0)),
                pl.BlockSpec((1, d_pad), lambda i: (0, 0)),
            ],
            out_specs=[
                pl.BlockSpec((t_proj, d_pad), lambda i: (i, 0)),
                pl.BlockSpec((t_proj, 1), lambda i: (i, 0)),
                pl.BlockSpec((t_proj, 1), lambda i: (i, 0)),
            ],
        ),
        compiler_params=pltpu.CompilerParams(
            dimension_semantics=("parallel",)),
    )(h_p, w_t, a_src, a_dst)

    # Row-vector view of the src scores (pure reshape over N elements, negligible).
    s_src_row = s_src_col.reshape(1, n_pad)

    # ---- stage 2: tiled online masked softmax + aggregation ----
    z_item = jnp.dtype(compute_dtype).itemsize
    z_bytes = n_pad * d_pad * z_item
    vmem_cap = _vmem_capacity_bytes()
    vmem_ceiling = (vmem_cap * 3) // 4        # ~48 MiB on v7x, ~96 MiB on v5e/v6e
    if z_resident is None:
        z_resident = z_bytes <= ((8 << 20) if vmem_cap <= (64 << 20) else (24 << 20))

    grid = (n_pad // t_dst, n_pad // t_src)

    if z_resident:
        z_spec = pl.BlockSpec((n_pad, d_pad), lambda i, j: (0, 0))   # fetched once
        z_buf_bytes = 2 * z_bytes
    else:
        z_spec = pl.BlockSpec((t_src, d_pad), lambda i, j: (j, 0))   # streamed per j
        z_buf_bytes = 2 * t_src * d_pad * z_item

    vmem_need = (2 * t_dst * t_src                 # adj tile (int8), double-buffered
                 + z_buf_bytes                     # z
                 + 2 * (t_dst + t_src) * 4         # s_dst / s_src tiles
                 + 2 * t_dst * d_pad * 4           # resident output block
                 + t_dst * 128 * 4                 # running-max scratch (lane-padded)
                 + (4 << 20))                      # headroom
    vmem_limit = int(min(max(vmem_need, 32 << 20), vmem_ceiling))

    cost = pl.CostEstimate(
        flops=2 * n_pad * n_pad * d_pad + 8 * n_pad * n_pad,
        transcendentals=n_pad * n_pad,
        bytes_accessed=(n_pad * n_pad                                       # int8 adj
                        + (1 if z_resident else grid[0]) * n_pad * d_pad * z_item
                        + n_pad * d_pad * 4 + 2 * n_pad * 4),
    )

    out_p = pl.pallas_call(
        _make_attention_kernel(ones_col, t_src, z_resident),
        out_shape=jax.ShapeDtypeStruct((n_pad, d_pad), f32),
        grid_spec=pltpu.PrefetchScalarGridSpec(
            num_scalar_prefetch=0,
            grid=grid,
            in_specs=[
                pl.BlockSpec((t_dst, 1), lambda i, j: (i, 0)),        # s_dst (column)
                pl.BlockSpec((1, t_src), lambda i, j: (0, j)),        # s_src (row)
                pl.BlockSpec((t_dst, t_src), lambda i, j: (i, j)),    # adj tile (int8)
                z_spec,                                               # z (src rows)
            ],
            out_specs=pl.BlockSpec((t_dst, d_pad), lambda i, j: (i, 0)),
            scratch_shapes=[
                pltpu.VMEM((t_dst, 1), f32),        # running max
            ],
        ),
        compiler_params=pltpu.CompilerParams(
            dimension_semantics=("parallel", "arbitrary"),
            vmem_limit_bytes=vmem_limit),
        cost_estimate=cost,
    )(s_dst_col, s_src_row, adj_p, z_p)

    return out_p[:N, :out_dim]


# -------------------------------- reference ---------------------------------
def gat_reference(h, w_fc, w_attn, adj):
    """Pure-JAX f32 reference mirroring the DGL semantics (masked softmax over in-edges)."""
    out_dim = w_fc.shape[0]
    z = h @ w_fc.T
    s_src = z @ w_attn[0, :out_dim]
    s_dst = z @ w_attn[0, out_dim:]
    e = s_dst[:, None] + s_src[None, :]
    e = jnp.where(e > 0, e, LEAKY_SLOPE * e)
    e = jnp.where(adj > 0, e, MASK_VALUE)
    e = e - jnp.max(e, axis=-1, keepdims=True)
    p = jnp.where(adj > 0, jnp.exp(e), 0.0)
    return (p / jnp.sum(p, axis=-1, keepdims=True)) @ z


def xavier_normal(key, shape, gain):
    fan_out, fan_in = shape
    std = gain * np.sqrt(2.0 / (fan_in + fan_out))
    return std * jax.random.normal(key, shape, dtype=jnp.float32)


if __name__ == "__main__":
    # Small shapes that still exercise every padding / tiling path:
    # N is not a multiple of the node tile and out_dim is not a multiple of 128.
    N, in_dim, out_dim = 200, 32, 48
    key = jax.random.PRNGKey(0)
    k_h, k_fc, k_attn, k_adj = jax.random.split(key, 4)

    gain = float(np.sqrt(2.0))                                  # calculate_gain('relu')
    w_fc = xavier_normal(k_fc, (out_dim, in_dim), gain)         # fc.weight
    w_attn = xavier_normal(k_attn, (1, 2 * out_dim), gain)      # attn_fc.weight
    h = jax.random.normal(k_h, (N, in_dim), dtype=jnp.float32)

    # Random directed adjacency with self-loops (every node has >= 1 in-edge).
    adj = (jax.random.uniform(k_adj, (N, N)) < 0.2).astype(jnp.float32)
    adj = jnp.maximum(adj, jnp.eye(N, dtype=jnp.float32))

    ref = gat_reference(h, w_fc, w_attn, adj)

    # f32 path, small tiles -> 2x2 grid with resident z: exercises the multi-src-tile
    # online softmax and the MXU-carried denominator.
    out_f32 = jax.block_until_ready(
        gat_layer(h, w_fc, w_attn, adj, compute_dtype=jnp.float32,
                  dst_tile=128, src_tile=128))
    np.testing.assert_allclose(np.asarray(out_f32), np.asarray(ref),
                               rtol=2e-3, atol=2e-3)

    # Streaming-z fallback (large-graph configuration), still f32.
    out_stream = jax.block_until_ready(
        gat_layer(h, w_fc, w_attn, adj, compute_dtype=jnp.float32,
                  dst_tile=128, src_tile=128, z_resident=False))
    np.testing.assert_allclose(np.asarray(out_stream), np.asarray(ref),
                               rtol=2e-3, atol=2e-3)

    # Default fast path: bf16 matmuls, int8 adjacency stream, f32 softmax/accumulation.
    out_bf16 = jax.block_until_ready(gat_layer(h, w_fc, w_attn, adj))
    np.testing.assert_allclose(np.asarray(out_bf16), np.asarray(ref),
                               rtol=4e-2, atol=4e-2)

    print("KERNEL_OK")
</pallas_src>

<mosaic_0001>
module attributes {stable_mosaic.version = 11 : i64} {
  func.func @kernel(%arg0: i32, %arg1: memref<128x32xf32, #tpu.memory_space<vmem>>, %arg2: memref<32x128xf32, #tpu.memory_space<vmem>>, %arg3: memref<1x128xf32, #tpu.memory_space<vmem>>, %arg4: memref<1x128xf32, #tpu.memory_space<vmem>>, %arg5: memref<128x128xf32, #tpu.memory_space<vmem>>, %arg6: memref<128x1xf32, #tpu.memory_space<vmem>>, %arg7: memref<128x1xf32, #tpu.memory_space<vmem>>) attributes {dimension_semantics = [#tpu.dimension_semantics<parallel>], iteration_bounds = array<i64: 2>, scalar_prefetch = 0 : i64, scratch_operands = 0 : i64, tpu.core_type = #tpu.core_type<tc>, window_params = [{transform_indices = @transform_0, window_bounds = array<i64: 128, 32>}, {pipeline_mode = #tpu.pipeline_mode<synchronous>, transform_indices = @transform_1, window_bounds = array<i64: 32, 128>}, {pipeline_mode = #tpu.pipeline_mode<synchronous>, transform_indices = @transform_2, window_bounds = array<i64: 1, 128>}, {pipeline_mode = #tpu.pipeline_mode<synchronous>, transform_indices = @transform_3, window_bounds = array<i64: 1, 128>}, {transform_indices = @transform_4, window_bounds = array<i64: 128, 128>}, {transform_indices = @transform_5, window_bounds = array<i64: 128, 1>}, {transform_indices = @transform_6, window_bounds = array<i64: 128, 1>}]} {
    %c0 = arith.constant 0 : index
    %c0_0 = arith.constant 0 : index
    %0 = vector.load %arg1[%c0, %c0_0] : memref<128x32xf32, #tpu.memory_space<vmem>>, vector<128x32xf32>
    %c0_1 = arith.constant 0 : index
    %c0_2 = arith.constant 0 : index
    %1 = vector.load %arg2[%c0_1, %c0_2] : memref<32x128xf32, #tpu.memory_space<vmem>>, vector<32x128xf32>
    %cst = arith.constant dense<0.000000e+00> : vector<128x128xf32>
    %2 = tpu.matmul %0, %1, %cst {dimension_numbers = #tpu.dot_dimension_numbers<[1], [0], [0], [1], [0, 0, 1, 1], [], []>} : vector<128x32xf32>, vector<32x128xf32>, vector<128x128xf32> -> vector<128x128xf32>
    %c0_3 = arith.constant 0 : index
    %c0_4 = arith.constant 0 : index
    %3 = vector.load %arg3[%c0_3, %c0_4] : memref<1x128xf32, #tpu.memory_space<vmem>>, vector<1x128xf32>
    %4 = vector.broadcast %3 : vector<1x128xf32> to vector<128x128xf32>
    %5 = arith.mulf %2, %4 : vector<128x128xf32>
    %cst_5 = arith.constant dense<0.000000e+00> : vector<128xf32>
    %6 = vector.multi_reduction <add>, %5, %cst_5 [1] : vector<128x128xf32> to vector<128xf32>
    %7 = vector.shape_cast %6 : vector<128xf32> to vector<128x1xf32>
    %c0_6 = arith.constant 0 : index
    %c0_7 = arith.constant 0 : index
    %8 = vector.load %arg6[%c0_6, %c0_7] : memref<128x1xf32, #tpu.memory_space<vmem>>, vector<128x1xf32>
    tpu.vector_store %arg6[%c0_6, %c0_7], %7 {strides = array<i32>} : memref<128x1xf32, #tpu.memory_space<vmem>>, vector<128x1xf32>,
    %c0_8 = arith.constant 0 : index
    %c0_9 = arith.constant 0 : index
    %9 = vector.load %arg4[%c0_8, %c0_9] : memref<1x128xf32, #tpu.memory_space<vmem>>, vector<1x128xf32>
    %10 = vector.broadcast %9 : vector<1x128xf32> to vector<128x128xf32>
    %11 = arith.mulf %2, %10 : vector<128x128xf32>
    %cst_10 = arith.constant dense<0.000000e+00> : vector<128xf32>
    %12 = vector.multi_reduction <add>, %11, %cst_10 [1] : vector<128x128xf32> to vector<128xf32>
    %13 = vector.shape_cast %12 : vector<128xf32> to vector<128x1xf32>
    %c0_11 = arith.constant 0 : index
    %c0_12 = arith.constant 0 : index
    %14 = vector.load %arg7[%c0_11, %c0_12] : memref<128x1xf32, #tpu.memory_space<vmem>>, vector<128x1xf32>
    tpu.vector_store %arg7[%c0_11, %c0_12], %13 {strides = array<i32>} : memref<128x1xf32, #tpu.memory_space<vmem>>, vector<128x1xf32>,
    %15 = tpu.iota {dimensions = array<i32: 1>} : vector<128x128xi32>
    %c48_i32 = arith.constant 48 : i32
    %16 = vector.broadcast %c48_i32 : i32 to vector<128x128xi32>
    %17 = arith.cmpi eq, %15, %16 : vector<128x128xi32>
    %cst_13 = arith.constant 1.000000e+00 : f32
    %18 = vector.broadcast %cst_13 : f32 to vector<128x128xf32>
    %19 = arith.select %17, %18, %2 : vector<128x128xi1>, vector<128x128xf32>
    %c0_14 = arith.constant 0 : index
    %c0_15 = arith.constant 0 : index
    %20 = vector.load %arg5[%c0_14, %c0_15] : memref<128x128xf32, #tpu.memory_space<vmem>>, vector<128x128xf32>
    tpu.vector_store %arg5[%c0_14, %c0_15], %19 {strides = array<i32>} : memref<128x128xf32, #tpu.memory_space<vmem>>, vector<128x128xf32>,
    return
  }
  func.func @transform_0(%arg0: i32) -> (i32, i32) {
    %c0_i32 = arith.constant 0 : i32
    %c0_i32_0 = arith.constant 0 : i32
    return %arg0, %c0_i32 : i32, i32
  }
  func.func @transform_1(%arg0: i32) -> (i32, i32) {
    %c0_i32 = arith.constant 0 : i32
    %c0_i32_0 = arith.constant 0 : i32
    %c0_i32_1 = arith.constant 0 : i32
    return %c0_i32, %c0_i32_0 : i32, i32
  }
  func.func @transform_2(%arg0: i32) -> (i32, i32) {
    %c0_i32 = arith.constant 0 : i32
    %c0_i32_0 = arith.constant 0 : i32
    %c0_i32_1 = arith.constant 0 : i32
    return %c0_i32, %c0_i32_0 : i32, i32
  }
  func.func @transform_3(%arg0: i32) -> (i32, i32) {
    %c0_i32 = arith.constant 0 : i32
    %c0_i32_0 = arith.constant 0 : i32
    %c0_i32_1 = arith.constant 0 : i32
    return %c0_i32, %c0_i32_0 : i32, i32
  }
  func.func @transform_4(%arg0: i32) -> (i32, i32) {
    %c0_i32 = arith.constant 0 : i32
    %c0_i32_0 = arith.constant 0 : i32
    return %arg0, %c0_i32 : i32, i32
  }
  func.func @transform_5(%arg0: i32) -> (i32, i32) {
    %c0_i32 = arith.constant 0 : i32
    %c0_i32_0 = arith.constant 0 : i32
    return %arg0, %c0_i32 : i32, i32
  }
  func.func @transform_6(%arg0: i32) -> (i32, i32) {
    %c0_i32 = arith.constant 0 : i32
    %c0_i32_0 = arith.constant 0 : i32
    return %arg0, %c0_i32 : i32, i32
  }
}

</mosaic_0001>

<bundles_post_ra>
// kernel: tpu_custom_call.1
= control target key start
LH: loop header
LB: loop body
LE: loop exit
PB: predicated region body
PF: predicated region fallthrough
CT: control target
= control target key end

     0   :  { %12 = vsyncpa [#allocation3], 0  ;;  %s1378_s0 = inlined_call_operand.vmem [shape: f32[256,32], index: 0, kind: input, shape index: {}]   ;;  %s1379_s1 = inlined_call_operand.vmem [shape: f32[32,128], index: 1, kind: input, shape index: {}]   ;;  %s1380_s2 = inlined_call_operand.vmem [shape: f32[1,128], index: 2, kind: input, shape index: {}]   ;;  %s1381_s3 = inlined_call_operand.vmem [shape: f32[1,128], index: 3, kind: input, shape index: {}]   ;;  %s1382_s4 = inlined_call_operand.hbm [shape: f32[256,128], index: 4, kind: output, shape index: {0}]   ;;  %s1383_s5 = inlined_call_operand.vmem [shape: f32[256,1], index: 5, kind: output, shape index: {1}]   ;;  %s1384_s6 = inlined_call_operand.vmem [shape: f32[256,1], index: 6, kind: output, shape index: {2}]  }
   0x1   :  { %14 = vsyncpa [#allocation3 + $0x1], 0  ;;  %s1052_s21 = smov 0   ;;  %s1054_s22 = smov 0  }
   0x2   :  { %s1056_s23 = smov 0   ;;  %s1058_s24 = smov 0  }
   0x3 LB: > { %s1073_s25 = sadd.s32 4294967295, %s1012_s24   ;;  %s816_s26 = sadd.s32 4294967294, %s1012_s24   ;;  %s1012_s24 = sphi %s1058_s24, %s1390_s24   ;;  %s1008_s23 = sphi %s1056_s23, %s1389_s23   ;;  %s1004_s22 = sphi %s1054_s22, %s1388_s22   ;;  %s1000_s21 = sphi %s1052_s21, %s1387_s21  }
   0x4   : > { %s1077_s27 = sadd.s32 1, %s1012_s24   ;;  %s116_s28 = sadd.s32 1, %s1008_s23 }
   0x5   : > { %s113_s29 = ssub.s32 %s1012_s24, %s1077_s27  ;;  %p126_p0 = scmp.ne.s32.totalorder %s1008_s23, %s1004_s22 }
   0x6   : > { %p114_p1 = scmp.eq.s32.totalorder %s113_s29, 0  ;;  %p127_p2 = scmp.eq.s32.totalorder %s1073_s25, 1 }
   0x7   : > { %p132_p3 = scmp.ne.s32.totalorder %s1004_s22, %s1000_s21  ;;  %p133_p4 = scmp.eq.s32.totalorder %s816_s26, 1 }
   0x8   : > { %s1088_s30 = scalar_select %p114_p1, %s1008_s23, %s116_s28  }
   0x9   : > { %p1090_p5 = por %p127_p2, %p126_p0  ;;  %p1094_p6 = por %p133_p4, %p132_p3 }
   0xa   : > { %p819_p7 = scmp.ge.s32.totalorder %s1012_s24, 1  ;;  %p221_p8 = scmp.lt.s32.totalorder %s1012_s24, 3 }
   0xc   : > { %p222_p9 = pnand %p819_p7, %p221_p8 }
   0xd   : > { %s821_s13 = sshll.u32 (!%p222_p9), %s1073_s25, 4  ;;  %s244_s28 = sand.u32 (!%p222_p9), 1, %s1004_s22  }
   0xe   : > { %225 = sbr.rel (%p222_p9) target bundleno = 423 (0x1a7), region = 36  ;;  %p262_p10 = scmp.lt.s32.totalorder (!%p222_p9), %s821_s13, 31 }
   0xf   : > { %s820_s29 = sshll.u32 (!%p222_p9), %s244_s28, 7  ;;  %s850_s14 = sshll.u32 (!%p222_p9), %s1073_s25, 11 }
  0x10   : > { %s1170_s11 = scalar_lea.vmem (!%p222_p9), [#allocation2], %s820_s29  ;;  %s1256_s19 = scalar_lea.hbm (!%p222_p9), %s1382_s4, %s850_s14 }
  0x11   : > { %s696_s15 = sshll.u32 (!%p222_p9), %s1170_s11, 4  ;;  %s1262_s20 = scalar_lea.sflag (!%p222_p9), [#allocation3], %s244_s28  ;;  %s1258_s15 = int_to_ptr.vmem [resolvable:$true] %s696_s15 }
  0x12   : > { %s1014_s25 = smov (!%p222_p9), [#allocation2]  }
  0x13   : > { %v299_v0 = vld [vmem:[%s1379_s1 + $0x18] sm:$0xff]  ;;  %v298_v1 = vld [vmem:[%s1379_s1 + $0x10] sm:$0xff]  ;;  %v297_v2 = vld [vmem:[%s1379_s1 + $0x8] sm:$0xff]  ;;  %s1392_s13 = smov (!%p262_p10, %s821_s13), 31  ;;  %vm300_vm0 = vcmask 261120   ;;  %v637_v20 = vlaneseq  ;;  %s956_s29 = sshll.u32 %s1014_s25, 4  ;;  %s957_s29 = int_to_ptr.vmem [resolvable:$false] %s956_s29 }
  0x14   : > { %871 = vmatprep.subr.mxu0 %v299_v0  ;;  %903 = vmatprep.subr.mxu1 %v299_v0  ;;  %v296_v3 = vld [vmem:[%s1379_s1] sm:$0xff]  ;;  %s1113_s18 = sshll.u32 %s1392_s13, 3  ;;  %s958_s9 = scalar_lea.vmem %s957_s29, 4096 }
  0x15   : > { %872 = vmatpush3.msra.mxu0 %v299_v0  ;;  %907 = vmatpush3.msra.mxu1 %v299_v0  ;;  %s1119_s26 = scalar_lea.vmem %s1378_s0, %s1113_s18  ;;  %v1154_v21 = vand.u32 127, %v637_v20  ;;  %v1162_v22 = vld [vmem:[%s1380_s2] ss:$0 sm:$0xff]  ;;  %p959_p0 = scmp.lt.s32.totalorder %s1258_s15, %s957_s29 }
  0x16   : > { %873 = vmatprep.subr.mxu0 %v298_v1  ;;  %904 = vmatprep.subr.mxu1 %v298_v1  ;;  %v280_v4 = vld [vmem:[%s1119_s26] sm:$0xff]  ;;  %v281_v6 = vld [vmem:[%s1119_s26 + $0x8] sm:$0xff]  ;;  %v282_v8 = vld [vmem:[%s1119_s26 + $0x10] sm:$0xff] }
  0x17   : > { %874 = vmatpush3.msra.mxu0 %v298_v1  ;;  %908 = vmatpush3.msra.mxu1 %v298_v1  ;;  %v288_v5 = vld [vmem:[%s1119_s26 + $0x40] sm:$0xff]  ;;  %v289_v7 = vld [vmem:[%s1119_s26 + $0x48] sm:$0xff]  ;;  %v290_v9 = vld [vmem:[%s1119_s26 + $0x50] sm:$0xff]  ;;  %vm639_vm1 = vcmp.eq.s32.totalorder %v1154_v21, 48 }
  0x18   : > { %875 = vmatprep.subr.mxu0 %v297_v2  ;;  %905 = vmatprep.subr.mxu1 %v297_v2  ;;  %v283_v10 = vld [vmem:[%s1119_s26 + $0x18] sm:$0xff]  ;;  %v284_v12 = vld [vmem:[%s1119_s26 + $0x20] sm:$0xff]  ;;  %v285_v14 = vld [vmem:[%s1119_s26 + $0x28] sm:$0xff] }
  0x19   : > { %876 = vmatpush3.msra.mxu0 %v297_v2  ;;  %909 = vmatpush3.msra.mxu1 %v297_v2  ;;  %v291_v11 = vld [vmem:[%s1119_s26 + $0x58] sm:$0xff]  ;;  %v292_v13 = vld [vmem:[%s1119_s26 + $0x60] sm:$0xff]  ;;  %v293_v15 = vld [vmem:[%s1119_s26 + $0x68] sm:$0xff] }
  0x1a   : > { %877 = vmatprep.subr.mxu0 %v296_v3  ;;  %906 = vmatprep.subr.mxu1 %v296_v3  ;;  %v286_v16 = vld [vmem:[%s1119_s26 + $0x30] sm:$0xff]  ;;  %v287_v18 = vld [vmem:[%s1119_s26 + $0x38] sm:$0xff]  ;;  %v1177_v31 = vld [vmem:[%s1381_s3] ss:$0 sm:$0xff] }
  0x1b   : > { %878 = vmatpush3.msra.mxu0 %v296_v3  ;;  %910 = vmatpush3.msra.mxu1 %v296_v3  ;;  %v294_v17 = vld [vmem:[%s1119_s26 + $0x70] sm:$0xff]  ;;  %v295_v19 = vld [vmem:[%s1119_s26 + $0x78] sm:$0xff]  ;;  %s952_s26 = scalar_lea.vmem %s1258_s15, 2048 }
  0x1c   : > { %879 = vmatprep.mubr.msk.f32.mxu0 %vm300_vm0, %v280_v4  ;;  %891 = vmatprep.mubr.msk.f32.mxu1 %vm300_vm0, %v288_v5  ;;  %p953_p11 = scmp.ne.s32.totalorder %s1258_s15, %s952_s26  ;;  %p960_p1 = scmp.lt.s32.totalorder %s958_s9, %s952_s26 }
  0x1d   : > { %880 = vmatmul.mubr.msk.f32.vlgmr.msra.gmra.mxu0 %vm300_vm0, %v281_v6  ;;  %892 = vmatmul.mubr.msk.f32.vlgmr.msra.gmra.mxu1 %vm300_vm0, %v289_v7 }
  0x1e   : > { %882 = vmatprep.mubr.msk.f32.mxu0 %vm300_vm0, %v282_v8  ;;  %894 = vmatprep.mubr.msk.f32.mxu1 %vm300_vm0, %v290_v9  ;;  %p954_p12 = pnand %p953_p11, %p1090_p5  ;;  %p961_p2 = por %p960_p1, %p959_p0 }
  0x20   : > { %p955_p13 = pneg %p954_p12 }
  0x21   : > { %883 = vmatmul.mubr.msk.f32.gmra.mxu0 %vm300_vm0, %v283_v10  ;;  %895 = vmatmul.mubr.msk.f32.gmra.mxu1 %vm300_vm0, %v291_v11 }
  0x22   : > { %885 = vmatprep.mubr.msk.f32.mxu0 %vm300_vm0, %v284_v12  ;;  %897 = vmatprep.mubr.msk.f32.mxu1 %vm300_vm0, %v292_v13  ;;  %p962_p3 = pnand %p961_p2, %p955_p13 }
  0x25   : > { %886 = vmatmul.mubr.msk.f32.gmra.mxu0 %vm300_vm0, %v285_v14  ;;  %898 = vmatmul.mubr.msk.f32.gmra.mxu1 %vm300_vm0, %v293_v15 }
  0x26   : > { %888 = vmatprep.mubr.msk.f32.mxu0 %vm300_vm0, %v286_v16  ;;  %900 = vmatprep.mubr.msk.f32.mxu1 %vm300_vm0, %v294_v17 }
  0x29   : > { %889 = vmatmul.mubr.msk.f32.gmra.mxu0 %vm300_vm0, %v287_v18  ;;  %901 = vmatmul.mubr.msk.f32.gmra.mxu1 %vm300_vm0, %v295_v19 }
  0xdd   : > { %v881_v23 = vpop.f32.mrf.mxu0  ;;  %v893_v24 = vpop.f32.mrf.mxu1 }
  0xde   : > { %v641_v25 = vsel %vm639_vm1, 1.0, %v881_v23  ;;  %v649_v26 = vsel %vm639_vm1, 1.0, %v893_v24  ;;  %v510_v27 = vmul.f32 %v893_v24, %v1162_v22  ;;  %v502_v28 = vmul.f32 %v881_v23, %v1162_v22 }
  0xdf   : > { %657 = vst [vmem:[%s1170_s11 + $0x8] sm:$0xff] %v641_v25  ;;  %665 = vst [vmem:[%s1170_s11 + $0x48] sm:$0xff] %v649_v26  ;;  %v415_v29 = vpop.f32.mrf.mxu0  ;;  %v455_v30 = vpop.f32.mrf.mxu1  ;;  %v574_v36 = vmul.f32 %v881_v23, %v1177_v31  ;;  %v582_v46 = vmul.f32 %v893_v24, %v1177_v31 }
  0xe0   : > { %v640_v32 = vsel %vm639_vm1, 1.0, %v415_v29  ;;  %v648_v33 = vsel %vm639_vm1, 1.0, %v455_v30  ;;  %535 = vadd.xlane.f32.xlu1 %v510_v27  ;;  %519 = vadd.xlane.f32.xlu0 %v502_v28  ;;  %v501_v37 = vmul.f32 %v1162_v22, %v415_v29  ;;  %v509_v47 = vmul.f32 %v1162_v22, %v455_v30 }
  0xe1   : > { %656 = vst [vmem:[%s1170_s11] sm:$0xff] %v640_v32  ;;  %664 = vst [vmem:[%s1170_s11 + $0x40] sm:$0xff] %v648_v33  ;;  %v884_v34 = vpop.f32.mrf.mxu0  ;;  %v896_v35 = vpop.f32.mrf.mxu1  ;;  %v573_v57 = vmul.f32 %v1177_v31, %v415_v29  ;;  %v581_v1 = vmul.f32 %v1177_v31, %v455_v30 }
  0xe2   : > { %v643_v38 = vsel %vm639_vm1, 1.0, %v884_v34  ;;  %v651_v39 = vsel %vm639_vm1, 1.0, %v896_v35  ;;  %v504_v52 = vmul.f32 %v884_v34, %v1162_v22  ;;  %v512_v62 = vmul.f32 %v896_v35, %v1162_v22 }
  0xe3   : > { %659 = vst [vmem:[%s1170_s11 + $0x18] sm:$0xff] %v643_v38  ;;  %v425_v40 = vpop.f32.mrf.mxu0  ;;  %667 = vst [vmem:[%s1170_s11 + $0x58] sm:$0xff] %v651_v39  ;;  %v465_v41 = vpop.f32.mrf.mxu1  ;;  %v576_v3 = vmul.f32 %v884_v34, %v1177_v31  ;;  %v584_v4 = vmul.f32 %v896_v35, %v1177_v31 }
  0xe4   : > { %591 = vadd.xlane.f32.xlu1 %v574_v36  ;;  %517 = vadd.xlane.f32.xlu0 %v501_v37  ;;  %v642_v42 = vsel %vm639_vm1, 1.0, %v425_v40  ;;  %v650_v43 = vsel %vm639_vm1, 1.0, %v465_v41  ;;  %v511_v2 = vmul.f32 %v1162_v22, %v465_v41  ;;  %v575_v5 = vmul.f32 %v1177_v31, %v425_v40 }
  0xe5   : > { %658 = vst [vmem:[%s1170_s11 + $0x10] sm:$0xff] %v642_v42  ;;  %666 = vst [vmem:[%s1170_s11 + $0x50] sm:$0xff] %v650_v43  ;;  %v887_v44 = vpop.f32.mrf.mxu0  ;;  %v899_v45 = vpop.f32.mrf.mxu1  ;;  %v583_v6 = vmul.f32 %v1177_v31, %v465_v41  ;;  %v503_v7 = vmul.f32 %v1162_v22, %v425_v40 }
  0xe6   : > { %v645_v48 = vsel %vm639_vm1, 1.0, %v887_v44  ;;  %v653_v49 = vsel %vm639_vm1, 1.0, %v899_v45  ;;  %v506_v8 = vmul.f32 %v887_v44, %v1162_v22  ;;  %v514_v10 = vmul.f32 %v899_v45, %v1162_v22 }
  0xe7   : > { %661 = vst [vmem:[%s1170_s11 + $0x28] sm:$0xff] %v645_v48  ;;  %v435_v50 = vpop.f32.mrf.mxu0  ;;  %669 = vst [vmem:[%s1170_s11 + $0x68] sm:$0xff] %v653_v49  ;;  %v475_v51 = vpop.f32.mrf.mxu1  ;;  %v578_v12 = vmul.f32 %v887_v44, %v1177_v31  ;;  %v586_v14 = vmul.f32 %v899_v45, %v1177_v31 }
  0xe8   : > { %607 = vadd.xlane.f32.xlu1 %v582_v46  ;;  %533 = vadd.xlane.f32.xlu0 %v509_v47  ;;  %v644_v53 = vsel %vm639_vm1, 1.0, %v435_v50  ;;  %v652_v54 = vsel %vm639_vm1, 1.0, %v475_v51  ;;  %v505_v9 = vmul.f32 %v1162_v22, %v435_v50  ;;  %v513_v11 = vmul.f32 %v1162_v22, %v475_v51 }
  0xe9   : > { %660 = vst [vmem:[%s1170_s11 + $0x20] sm:$0xff] %v644_v53  ;;  %668 = vst [vmem:[%s1170_s11 + $0x60] sm:$0xff] %v652_v54  ;;  %v890_v55 = vpop.f32.mrf.mxu0  ;;  %v902_v56 = vpop.f32.mrf.mxu1  ;;  %v577_v13 = vmul.f32 %v1177_v31, %v435_v50  ;;  %v585_v15 = vmul.f32 %v1177_v31, %v475_v51 }
  0xea   : > { %v647_v58 = vsel %vm639_vm1, 1.0, %v890_v55  ;;  %v655_v59 = vsel %vm639_vm1, 1.0, %v902_v56  ;;  %v508_v16 = vmul.f32 %v890_v55, %v1162_v22  ;;  %v516_v18 = vmul.f32 %v902_v56, %v1162_v22 }
  0xeb   : > { %663 = vst [vmem:[%s1170_s11 + $0x38] sm:$0xff] %v647_v58  ;;  %v445_v60 = vpop.f32.mrf.mxu0  ;;  %671 = vst [vmem:[%s1170_s11 + $0x78] sm:$0xff] %v655_v59  ;;  %v485_v61 = vpop.f32.mrf.mxu1  ;;  %v580_v20 = vmul.f32 %v890_v55, %v1177_v31  ;;  %v588_v23 = vmul.f32 %v902_v56, %v1177_v31 }
  0xec   : > { %589 = vadd.xlane.f32.xlu0 %v573_v57  ;;  %523 = vadd.xlane.f32.xlu1 %v504_v52  ;;  %v646_v63 = vsel %vm639_vm1, 1.0, %v445_v60  ;;  %v654_v0 = vsel %vm639_vm1, 1.0, %v485_v61  ;;  %v507_v17 = vmul.f32 %v1162_v22, %v445_v60  ;;  %v515_v19 = vmul.f32 %v1162_v22, %v485_v61 }
  0xed   : > { %662 = vst [vmem:[%s1170_s11 + $0x30] sm:$0xff] %v646_v63  ;;  %670 = vst [vmem:[%s1170_s11 + $0x70] sm:$0xff] %v654_v0  ;;  %v579_v21 = vmul.f32 %v1177_v31, %v445_v60  ;;  %v587_v24 = vmul.f32 %v1177_v31, %v485_v61 }
  0xf0   : > { %605 = vadd.xlane.f32.xlu0 %v581_v1  ;;  %539 = vadd.xlane.f32.xlu1 %v512_v62 }
  0xf4   : > { %537 = vadd.xlane.f32.xlu0 %v511_v2  ;;  %595 = vadd.xlane.f32.xlu1 %v576_v3 }
  0xf8   : > { %611 = vadd.xlane.f32.xlu1 %v584_v4  ;;  %593 = vadd.xlane.f32.xlu0 %v575_v5 }
  0xfc   : > { %609 = vadd.xlane.f32.xlu0 %v583_v6  ;;  %521 = vadd.xlane.f32.xlu1 %v503_v7 }
 0x100   : > { %527 = vadd.xlane.f32.xlu1 %v506_v8  ;;  %525 = vadd.xlane.f32.xlu0 %v505_v9 }
 0x104   : > { %543 = vadd.xlane.f32.xlu1 %v514_v10  ;;  %541 = vadd.xlane.f32.xlu0 %v513_v11 }
 0x108   : > { %599 = vadd.xlane.f32.xlu1 %v578_v12  ;;  %597 = vadd.xlane.f32.xlu0 %v577_v13 }
 0x10c   : > { %615 = vadd.xlane.f32.xlu1 %v586_v14  ;;  %613 = vadd.xlane.f32.xlu0 %v585_v15 }
 0x110   : > { %531 = vadd.xlane.f32.xlu1 %v508_v16  ;;  %529 = vadd.xlane.f32.xlu0 %v507_v17 }
 0x114   : > { %547 = vadd.xlane.f32.xlu1 %v516_v18  ;;  %545 = vadd.xlane.f32.xlu0 %v515_v19 }
 0x118   : > { %603 = vadd.xlane.f32.xlu1 %v580_v20  ;;  %601 = vadd.xlane.f32.xlu0 %v579_v21 }
 0x11c   : > { %619 = vadd.xlane.f32.xlu1 %v588_v23  ;;  %617 = vadd.xlane.f32.xlu0 %v587_v24 }
 0x11d   : > { %965 = shalt.err (!%p962_p3)
}
 0x11e   : > { %s966_s28 = scalar_lea.hbm %s1256_s19, 2048  ;;  %s970_s12 = scalar_lea.hbm %s1382_s4, 4096 }
 0x11f   : > { %p967_p4 = scmp.ne.s32.totalorder %s1256_s19, %s966_s28  ;;  %p971_p9 = scmp.lt.s32.totalorder %s1256_s19, %s1382_s4 }
 0x120   : > { %p972_p10 = scmp.lt.s32.totalorder %s970_s12, %s966_s28 }
 0x121   : > { %p968_p7 = pnand %p967_p4, %p1090_p5 }
 0x122   : > { %p973_p11 = por %p972_p10, %p971_p9 }
 0x123   : > { %p969_p8 = pneg %p968_p7 }
 0x125   : > { %p974_p12 = pnand %p973_p11, %p969_p8 }
 0x127   : > { %977 = shalt.err (!%p974_p12)
}
 0x128   : > { %s1015_s16 = smov 128   ;;  %s1016_s17 = smov 8   ;;  %vm549_vm2 = vcmask 7168  }
 0x129   : > { %911 = dma.vmem_to_hbm [thread:$0]  (%p1090_p5), %s1258_s15, 2048, %s1256_s19, %s1262_s20, %s1015_s16, %s1015_s16, %s1016_s17  }
 0x12a   : > { %s1289_s29 = scalar_lea.vmem %s1383_s5, %s1113_s18  ;;  %s1299_s15 = scalar_lea.vmem %s1384_s6, %s1113_s18 }
 0x169   : > { %v536_v22 = vpop.xlane.xlu1 %535  ;;  %v520_v25 = vpop.xlane.xlu0 %519 }
 0x16a   : > { %559 = vst.msk [vmem:[%s1289_s29 + $0x48] sm:$0xff] %vm549_vm2, %v536_v22  ;;  %551 = vst.msk [vmem:[%s1289_s29 + $0x8] sm:$0xff] %vm549_vm2, %v520_v25 }
 0x16d   : > { %v592_v26 = vpop.xlane.xlu1 %591  ;;  %v518_v27 = vpop.xlane.xlu0 %517 }
 0x16e   : > { %622 = vst.msk [vmem:[%s1299_s15 + $0x8] sm:$0xff] %vm549_vm2, %v592_v26  ;;  %550 = vst.msk [vmem:[%s1289_s29] sm:$0xff] %vm549_vm2, %v518_v27 }
 0x171   : > { %v608_v28 = vpop.xlane.xlu1 %607  ;;  %v534_v29 = vpop.xlane.xlu0 %533 }
 0x172   : > { %630 = vst.msk [vmem:[%s1299_s15 + $0x48] sm:$0xff] %vm549_vm2, %v608_v28  ;;  %558 = vst.msk [vmem:[%s1289_s29 + $0x40] sm:$0xff] %vm549_vm2, %v534_v29 }
 0x175   : > { %v590_v30 = vpop.xlane.xlu0 %589  ;;  %v524_v31 = vpop.xlane.xlu1 %523 }
 0x176   : > { %621 = vst.msk [vmem:[%s1299_s15] sm:$0xff] %vm549_vm2, %v590_v30  ;;  %553 = vst.msk [vmem:[%s1289_s29 + $0x18] sm:$0xff] %vm549_vm2, %v524_v31 }
 0x179   : > { %v606_v32 = vpop.xlane.xlu0 %605  ;;  %v540_v33 = vpop.xlane.xlu1 %539 }
 0x17a   : > { %629 = vst.msk [vmem:[%s1299_s15 + $0x40] sm:$0xff] %vm549_vm2, %v606_v32  ;;  %561 = vst.msk [vmem:[%s1289_s29 + $0x58] sm:$0xff] %vm549_vm2, %v540_v33 }
 0x17d   : > { %v538_v34 = vpop.xlane.xlu0 %537  ;;  %v596_v35 = vpop.xlane.xlu1 %595 }
 0x17e   : > { %560 = vst.msk [vmem:[%s1289_s29 + $0x50] sm:$0xff] %vm549_vm2, %v538_v34  ;;  %624 = vst.msk [vmem:[%s1299_s15 + $0x18] sm:$0xff] %vm549_vm2, %v596_v35 }
 0x181   : > { %v612_v36 = vpop.xlane.xlu1 %611  ;;  %v594_v37 = vpop.xlane.xlu0 %593 }
 0x182   : > { %632 = vst.msk [vmem:[%s1299_s15 + $0x58] sm:$0xff] %vm549_vm2, %v612_v36  ;;  %623 = vst.msk [vmem:[%s1299_s15 + $0x10] sm:$0xff] %vm549_vm2, %v594_v37 }
 0x185   : > { %v610_v38 = vpop.xlane.xlu0 %609  ;;  %v522_v39 = vpop.xlane.xlu1 %521 }
 0x186   : > { %631 = vst.msk [vmem:[%s1299_s15 + $0x50] sm:$0xff] %vm549_vm2, %v610_v38  ;;  %552 = vst.msk [vmem:[%s1289_s29 + $0x10] sm:$0xff] %vm549_vm2, %v522_v39 }
 0x189   : > { %v528_v40 = vpop.xlane.xlu1 %527  ;;  %v526_v41 = vpop.xlane.xlu0 %525 }
 0x18a   : > { %555 = vst.msk [vmem:[%s1289_s29 + $0x28] sm:$0xff] %vm549_vm2, %v528_v40  ;;  %554 = vst.msk [vmem:[%s1289_s29 + $0x20] sm:$0xff] %vm549_vm2, %v526_v41 }
 0x18d   : > { %v544_v42 = vpop.xlane.xlu1 %543  ;;  %v542_v43 = vpop.xlane.xlu0 %541 }
 0x18e   : > { %563 = vst.msk [vmem:[%s1289_s29 + $0x68] sm:$0xff] %vm549_vm2, %v544_v42  ;;  %562 = vst.msk [vmem:[%s1289_s29 + $0x60] sm:$0xff] %vm549_vm2, %v542_v43 }
 0x191   : > { %v600_v44 = vpop.xlane.xlu1 %599  ;;  %v598_v45 = vpop.xlane.xlu0 %597 }
 0x192   : > { %626 = vst.msk [vmem:[%s1299_s15 + $0x28] sm:$0xff] %vm549_vm2, %v600_v44  ;;  %625 = vst.msk [vmem:[%s1299_s15 + $0x20] sm:$0xff] %vm549_vm2, %v598_v45 }
 0x195   : > { %v616_v46 = vpop.xlane.xlu1 %615  ;;  %v614_v47 = vpop.xlane.xlu0 %613 }
 0x196   : > { %634 = vst.msk [vmem:[%s1299_s15 + $0x68] sm:$0xff] %vm549_vm2, %v616_v46  ;;  %633 = vst.msk [vmem:[%s1299_s15 + $0x60] sm:$0xff] %vm549_vm2, %v614_v47 }
 0x199   : > { %v532_v48 = vpop.xlane.xlu1 %531  ;;  %v530_v49 = vpop.xlane.xlu0 %529 }
 0x19a   : > { %557 = vst.msk [vmem:[%s1289_s29 + $0x38] sm:$0xff] %vm549_vm2, %v532_v48  ;;  %556 = vst.msk [vmem:[%s1289_s29 + $0x30] sm:$0xff] %vm549_vm2, %v530_v49 }
 0x19d   : > { %v548_v50 = vpop.xlane.xlu1 %547  ;;  %v546_v51 = vpop.xlane.xlu0 %545 }
 0x19e   : > { %565 = vst.msk [vmem:[%s1289_s29 + $0x78] sm:$0xff] %vm549_vm2, %v548_v50  ;;  %564 = vst.msk [vmem:[%s1289_s29 + $0x70] sm:$0xff] %vm549_vm2, %v546_v51 }
 0x1a1   : > { %v604_v52 = vpop.xlane.xlu1 %603  ;;  %v602_v53 = vpop.xlane.xlu0 %601 }
 0x1a2   : > { %628 = vst.msk [vmem:[%s1299_s15 + $0x38] sm:$0xff] %vm549_vm2, %v604_v52  ;;  %627 = vst.msk [vmem:[%s1299_s15 + $0x30] sm:$0xff] %vm549_vm2, %v602_v53 }
 0x1a5   : > { %v620_v54 = vpop.xlane.xlu1 %619  ;;  %v618_v55 = vpop.xlane.xlu0 %617 }
 0x1a6   : > { %636 = vst.msk [vmem:[%s1299_s15 + $0x78] sm:$0xff] %vm549_vm2, %v620_v54  ;;  %635 = vst.msk [vmem:[%s1299_s15 + $0x70] sm:$0xff] %vm549_vm2, %v618_v55 }
 0x1a7 PF: > { %p917_p5 = scmp.ge.s32.totalorder %s1012_s24, 2  ;;  %s719_s18 = sand.u32 1, %s1000_s21  }
 0x1a8   : > { %s720_s19 = scalar_lea.sflag [#allocation3], %s719_s18 }
 0x1a9   : > { %p914_p13 = pnand %p917_p5, %p1094_p6 }
 0x1ab   : > { %p915_p0 = pneg %p914_p13 }
 0x1ad   : > { %995 = dma.done.wait (%p915_p0), %s720_s19, 2048  }
 0x1ae   : > { %997 = vsyncadd (%p915_p0), %s720_s19, 4294965248  ;;  %p17_p1 = scmp.ge.s32.totalorder %s1077_s27, 4   ;;  %s1387_s21 = smov %s1004_s22 }
 0x1af   : > { %s1388_s22 = smov %s1008_s23  ;;  %s1389_s23 = smov %s1088_s30 }
 0x1b0   : > { %s1390_s24 = smov %s1077_s27  ;;  %19 = sbr.rel (!%p17_p1) target bundleno = 3 (0x3), region = 95 }
 0x1b5   :  { %741 = vsyncpa [#allocation3], 1 }
 0x1b6   :  { %743 = vsyncpa [#allocation3 + $0x1], 1 }

</bundles_post_ra>
